<compile_context>
chip_gen: v5e
topology: v5e:2x2
jax: 0.10.0
libtpu: 0.0.40
codegen_flags: <defaults>
</compile_context>

<pallas_src>
import math

import jax
import jax.numpy as jnp
from jax import lax
from jax.experimental import pallas as pl
from jax.experimental.pallas import tpu as pltpu


def _make_kernel(H, W):
    HW = H * W

    def kernel(x_ref, wbd_ref, const_ref, o_ref):
        # x_ref:     (TILE_R, HW)     rows = (image, channel) pairs, lanes = H*W
        # wbd_ref:   (TILE_R, TILE_R) block-diagonal 1x1-conv weight (out, in)
        # const_ref: (2, HW)          row 0: 1/(#valid taps), row 1: image-row idx
        x = x_ref[...].astype(jnp.float32)                      # (TILE_R, HW)
        inv = const_ref[0:1, :].astype(jnp.float32)             # (1, HW)
        row = const_ref[1:2, :].astype(jnp.float32)             # (1, HW)

        def lroll(v, s):
            return pltpu.roll(v, s, axis=1)

        # ---- boundary masks from the (1, HW) row map (cheap XLU work, one
        # sublane).  A tap is valid iff its value came from the expected image
        # row; because the mask is computed with the SAME roll as the data it
        # is correct regardless of the hardware roll direction.  The (1, HW)
        # masks broadcast over the TILE_R sublanes inside jnp.where.
        ra, rb = lroll(row, 1), lroll(row, HW - 1)
        ru, rd = lroll(row, W), lroll(row, HW - W)
        va, vb = ra == row, rb == row                 # same row (horizontal taps)
        vu = jnp.abs(ru - row) == 1.0                 # adjacent row (vertical taps)
        vd = jnp.abs(rd - row) == 1.0                 # (whole-array wrap -> H-1 >= 2)

        # ---- horizontal 3-tap (separable pass 1): lane rolls by {1, HW-1}
        xa, xb = lroll(x, 1), lroll(x, HW - 1)
        hsum = x + jnp.where(va, xa, 0.0) + jnp.where(vb, xb, 0.0)
        hmax = jnp.maximum(x, jnp.maximum(jnp.where(va, xa, -jnp.inf),
                                          jnp.where(vb, xb, -jnp.inf)))

        # ---- vertical 3-tap (pass 2): lane rolls by {W, HW-W}
        su, sd = lroll(hsum, W), lroll(hsum, HW - W)
        tu, td = lroll(hmax, W), lroll(hmax, HW - W)
        psum = hsum + jnp.where(vu, su, 0.0) + jnp.where(vd, sd, 0.0)
        pmax = jnp.maximum(hmax, jnp.maximum(jnp.where(vu, tu, -jnp.inf),
                                             jnp.where(vd, td, -jnp.inf)))

        # ---- 1x1 conv on the MXU: block-diagonal weight mixes channels only
        # within each image of the tile.  HIGHEST precision -> true f32.
        wbd = wbd_ref[...].astype(jnp.float32)
        conv = jnp.dot(wbd, x, preferred_element_type=jnp.float32,
                       precision=lax.Precision.HIGHEST)

        # ---- skip_connect + avg_pool + max_pool + conv, one accumulator
        o_ref[...] = (x + psum * inv + pmax + conv).astype(o_ref.dtype)

    return kernel


def _choose_tile_rows(N, C, HW, max_tile_bytes=8 << 20):
    """Rows per grid step: a multiple of C (image-aligned for the block-diag
    conv) and of 8 (full f32 sublanes), capped so in+out double-buffered tiles
    stay well under v7x's 64 MiB/TC, split when possible for 2 TC grid steps."""
    rows = N * C
    base = C * (8 // math.gcd(C, 8))        # smallest multiple of both C and 8
    if base > rows or rows % base != 0:
        return rows                          # tiny problem: one full-array block
    budget_rows = max(base, max_tile_bytes // (HW * 4 * 4))   # 2 bufs * (in+out)
    tile = base
    while tile * 2 <= budget_rows and rows % (tile * 2) == 0:
        tile *= 2
    # keep >=2 grid steps when we can (v7x megacore), without dropping below base
    if rows // tile == 1 and tile > base and rows % (tile // 2) == 0:
        tile //= 2
    return tile


def mixed_op(x_nchw, w):
    """x_nchw: (N, C, H, W) float32 (PyTorch layout); w: (C, C) 1x1-conv weight
    with layout (in_ch, out_ch)."""
    N, C, H, W = x_nchw.shape
    assert H >= 3 and W >= 2, "adjacency masks assume H >= 3, W >= 2"
    HW = H * W
    rows = N * C

    tile_r = _choose_tile_rows(N, C, HW)
    assert rows % tile_r == 0 and tile_r % C == 0
    imgs_per_tile = tile_r // C

    x = x_nchw.reshape(rows, HW)            # lane-dense, image-major rows

    # block-diagonal 1x1-conv weight: (out_ch, in_ch) repeated on the diagonal
    wt = jnp.asarray(w, jnp.float32).T                          # (out_ch, in_ch)
    wbd = jnp.kron(jnp.eye(imgs_per_tile, dtype=jnp.float32), wt)  # (tile_r, tile_r)

    # count_include_pad=False divisor: 9 interior, 6 edges, 4 corners.
    cw = jnp.full((W,), 3.0, jnp.float32).at[0].set(2.0).at[W - 1].set(2.0)
    ch = jnp.full((H,), 3.0, jnp.float32).at[0].set(2.0).at[H - 1].set(2.0)
    inv_cnt = (1.0 / (ch[:, None] * cw[None, :])).reshape(1, HW)
    # image-row index per flat pixel (f32: exact for H < 2^24)
    row_map = (jnp.arange(HW) // W).astype(jnp.float32).reshape(1, HW)
    consts = jnp.concatenate([inv_cnt, row_map], axis=0)        # (2, HW)

    out = pl.pallas_call(
        _make_kernel(H, W),
        out_shape=jax.ShapeDtypeStruct((rows, HW), x.dtype),
        grid_spec=pltpu.PrefetchScalarGridSpec(
            num_scalar_prefetch=0,
            grid=(rows // tile_r,),
            in_specs=[
                pl.BlockSpec((tile_r, HW), lambda i: (i, 0)),
                pl.BlockSpec((tile_r, tile_r), lambda i: (0, 0)),
                pl.BlockSpec((2, HW), lambda i: (0, 0)),
            ],
            out_specs=pl.BlockSpec((tile_r, HW), lambda i: (i, 0)),
        ),
        compiler_params=pltpu.CompilerParams(
            dimension_semantics=("parallel",),
            vmem_limit_bytes=32 * 1024 * 1024,
        ),
    )(x, wbd, consts)

    return out.reshape(N, C, H, W)


def mixed_op_reference(x_nchw, w):
    """Plain-JAX reference with the same semantics (NCHW in/out)."""
    x = jnp.transpose(x_nchw, (0, 2, 3, 1))   # NHWC
    win = (1, 3, 3, 1)
    strides = (1, 1, 1, 1)
    pad = ((0, 0), (1, 1), (1, 1), (0, 0))

    psum = lax.reduce_window(x, 0.0, lax.add, win, strides, pad)
    pcnt = lax.reduce_window(jnp.ones_like(x), 0.0, lax.add, win, strides, pad)
    avg_pool = psum / pcnt                                     # count_include_pad=False
    max_pool = lax.reduce_window(x, -jnp.inf, lax.max, win, strides, pad)
    conv = jnp.einsum("nhwc,cd->nhwd", x, w, precision=lax.Precision.HIGHEST)
    out = x + avg_pool + max_pool + conv
    return jnp.transpose(out, (0, 3, 1, 2))


if __name__ == "__main__":
    key = jax.random.PRNGKey(0)
    kx, kw = jax.random.split(key)

    N, C, H, W = 2, 4, 16, 16
    x = jax.random.normal(kx, (N, C, H, W), dtype=jnp.float32)
    # deterministic 1x1-conv weight (in_ch, out_ch), kaiming-ish scale
    w = jax.random.normal(kw, (C, C), dtype=jnp.float32) * (1.0 / jnp.sqrt(C))

    out = jax.block_until_ready(mixed_op(x, w))
    ref = mixed_op_reference(x, w)

    assert out.shape == (N, C, H, W)
    assert jnp.allclose(out, ref, atol=1e-4, rtol=1e-4)

    print("KERNEL_OK")
</pallas_src>

<mosaic_0001>
module attributes {stable_mosaic.version = 11 : i64} {
  func.func @kernel(%arg0: i32, %arg1: memref<8x256xf32, #tpu.memory_space<vmem>>, %arg2: memref<8x8xf32, #tpu.memory_space<vmem>>, %arg3: memref<2x256xf32, #tpu.memory_space<vmem>>, %arg4: memref<8x256xf32, #tpu.memory_space<vmem>>) attributes {dimension_semantics = [#tpu.dimension_semantics<parallel>], iteration_bounds = array<i64: 1>, scalar_prefetch = 0 : i64, scratch_operands = 0 : i64, tpu.core_type = #tpu.core_type<tc>, window_params = [{transform_indices = @transform_0, window_bounds = array<i64: 8, 256>}, {pipeline_mode = #tpu.pipeline_mode<synchronous>, transform_indices = @transform_1, window_bounds = array<i64: 8, 8>}, {pipeline_mode = #tpu.pipeline_mode<synchronous>, transform_indices = @transform_2, window_bounds = array<i64: 2, 256>}, {transform_indices = @transform_3, window_bounds = array<i64: 8, 256>}]} {
    %c0 = arith.constant 0 : index
    %c0_0 = arith.constant 0 : index
    %0 = vector.load %arg1[%c0, %c0_0] : memref<8x256xf32, #tpu.memory_space<vmem>>, vector<8x256xf32>
    %c0_1 = arith.constant 0 : index
    %c0_2 = arith.constant 0 : index
    %1 = vector.load %arg3[%c0_1, %c0_2] : memref<2x256xf32, #tpu.memory_space<vmem>>, vector<1x256xf32>
    %c1 = arith.constant 1 : index
    %c0_3 = arith.constant 0 : index
    %2 = vector.load %arg3[%c1, %c0_3] : memref<2x256xf32, #tpu.memory_space<vmem>>, vector<1x256xf32>
    %c1_i32 = arith.constant 1 : i32
    %3 = tpu.dynamic_rotate %2 by %c1_i32 dim 1 : vector<1x256xf32>, i32 -> vector<1x256xf32>
    %c255_i32 = arith.constant 255 : i32
    %4 = tpu.dynamic_rotate %2 by %c255_i32 dim 1 : vector<1x256xf32>, i32 -> vector<1x256xf32>
    %c16_i32 = arith.constant 16 : i32
    %5 = tpu.dynamic_rotate %2 by %c16_i32 dim 1 : vector<1x256xf32>, i32 -> vector<1x256xf32>
    %c240_i32 = arith.constant 240 : i32
    %6 = tpu.dynamic_rotate %2 by %c240_i32 dim 1 : vector<1x256xf32>, i32 -> vector<1x256xf32>
    %7 = arith.cmpf oeq, %3, %2 : vector<1x256xf32>
    %8 = arith.cmpf oeq, %4, %2 : vector<1x256xf32>
    %9 = arith.subf %5, %2 : vector<1x256xf32>
    %10 = math.absf %9 : vector<1x256xf32>
    %cst = arith.constant 1.000000e+00 : f32
    %11 = vector.broadcast %cst : f32 to vector<1x256xf32>
    %12 = arith.cmpf oeq, %10, %11 : vector<1x256xf32>
    %13 = arith.subf %6, %2 : vector<1x256xf32>
    %14 = math.absf %13 : vector<1x256xf32>
    %cst_4 = arith.constant 1.000000e+00 : f32
    %15 = vector.broadcast %cst_4 : f32 to vector<1x256xf32>
    %16 = arith.cmpf oeq, %14, %15 : vector<1x256xf32>
    %c1_i32_5 = arith.constant 1 : i32
    %17 = tpu.dynamic_rotate %0 by %c1_i32_5 dim 1 : vector<8x256xf32>, i32 -> vector<8x256xf32>
    %c255_i32_6 = arith.constant 255 : i32
    %18 = tpu.dynamic_rotate %0 by %c255_i32_6 dim 1 : vector<8x256xf32>, i32 -> vector<8x256xf32>
    %cst_7 = arith.constant 0.000000e+00 : f32
    %19 = vector.shape_cast %7 : vector<1x256xi1> to vector<1x256xi1>
    %20 = vector.broadcast %19 : vector<1x256xi1> to vector<8x256xi1>
    %21 = vector.broadcast %cst_7 : f32 to vector<8x256xf32>
    %22 = arith.select %20, %17, %21 : vector<8x256xi1>, vector<8x256xf32>
    %23 = arith.addf %0, %22 : vector<8x256xf32>
    %cst_8 = arith.constant 0.000000e+00 : f32
    %24 = vector.shape_cast %8 : vector<1x256xi1> to vector<1x256xi1>
    %25 = vector.broadcast %24 : vector<1x256xi1> to vector<8x256xi1>
    %26 = vector.broadcast %cst_8 : f32 to vector<8x256xf32>
    %27 = arith.select %25, %18, %26 : vector<8x256xi1>, vector<8x256xf32>
    %28 = arith.addf %23, %27 : vector<8x256xf32>
    %cst_9 = arith.constant 0xFF800000 : f32
    %29 = vector.shape_cast %7 : vector<1x256xi1> to vector<1x256xi1>
    %30 = vector.broadcast %29 : vector<1x256xi1> to vector<8x256xi1>
    %31 = vector.broadcast %cst_9 : f32 to vector<8x256xf32>
    %32 = arith.select %30, %17, %31 : vector<8x256xi1>, vector<8x256xf32>
    %cst_10 = arith.constant 0xFF800000 : f32
    %33 = vector.shape_cast %8 : vector<1x256xi1> to vector<1x256xi1>
    %34 = vector.broadcast %33 : vector<1x256xi1> to vector<8x256xi1>
    %35 = vector.broadcast %cst_10 : f32 to vector<8x256xf32>
    %36 = arith.select %34, %18, %35 : vector<8x256xi1>, vector<8x256xf32>
    %37 = arith.maximumf %32, %36 : vector<8x256xf32>
    %38 = arith.maximumf %0, %37 : vector<8x256xf32>
    %c16_i32_11 = arith.constant 16 : i32
    %39 = tpu.dynamic_rotate %28 by %c16_i32_11 dim 1 : vector<8x256xf32>, i32 -> vector<8x256xf32>
    %c240_i32_12 = arith.constant 240 : i32
    %40 = tpu.dynamic_rotate %28 by %c240_i32_12 dim 1 : vector<8x256xf32>, i32 -> vector<8x256xf32>
    %c16_i32_13 = arith.constant 16 : i32
    %41 = tpu.dynamic_rotate %38 by %c16_i32_13 dim 1 : vector<8x256xf32>, i32 -> vector<8x256xf32>
    %c240_i32_14 = arith.constant 240 : i32
    %42 = tpu.dynamic_rotate %38 by %c240_i32_14 dim 1 : vector<8x256xf32>, i32 -> vector<8x256xf32>
    %cst_15 = arith.constant 0.000000e+00 : f32
    %43 = vector.shape_cast %12 : vector<1x256xi1> to vector<1x256xi1>
    %44 = vector.broadcast %43 : vector<1x256xi1> to vector<8x256xi1>
    %45 = vector.broadcast %cst_15 : f32 to vector<8x256xf32>
    %46 = arith.select %44, %39, %45 : vector<8x256xi1>, vector<8x256xf32>
    %47 = arith.addf %28, %46 : vector<8x256xf32>
    %cst_16 = arith.constant 0.000000e+00 : f32
    %48 = vector.shape_cast %16 : vector<1x256xi1> to vector<1x256xi1>
    %49 = vector.broadcast %48 : vector<1x256xi1> to vector<8x256xi1>
    %50 = vector.broadcast %cst_16 : f32 to vector<8x256xf32>
    %51 = arith.select %49, %40, %50 : vector<8x256xi1>, vector<8x256xf32>
    %52 = arith.addf %47, %51 : vector<8x256xf32>
    %cst_17 = arith.constant 0xFF800000 : f32
    %53 = vector.shape_cast %12 : vector<1x256xi1> to vector<1x256xi1>
    %54 = vector.broadcast %53 : vector<1x256xi1> to vector<8x256xi1>
    %55 = vector.broadcast %cst_17 : f32 to vector<8x256xf32>
    %56 = arith.select %54, %41, %55 : vector<8x256xi1>, vector<8x256xf32>
    %cst_18 = arith.constant 0xFF800000 : f32
    %57 = vector.shape_cast %16 : vector<1x256xi1> to vector<1x256xi1>
    %58 = vector.broadcast %57 : vector<1x256xi1> to vector<8x256xi1>
    %59 = vector.broadcast %cst_18 : f32 to vector<8x256xf32>
    %60 = arith.select %58, %42, %59 : vector<8x256xi1>, vector<8x256xf32>
    %61 = arith.maximumf %56, %60 : vector<8x256xf32>
    %62 = arith.maximumf %38, %61 : vector<8x256xf32>
    %c0_19 = arith.constant 0 : index
    %c0_20 = arith.constant 0 : index
    %63 = vector.load %arg2[%c0_19, %c0_20] : memref<8x8xf32, #tpu.memory_space<vmem>>, vector<8x8xf32>
    %cst_21 = arith.constant dense<0.000000e+00> : vector<8x256xf32>
    %64 = tpu.matmul %63, %0, %cst_21 {dimension_numbers = #tpu.dot_dimension_numbers<[1], [0], [0], [1], [0, 0, 1, 1], [], []>, precision = #tpu.contract_precision<fp32>} : vector<8x8xf32>, vector<8x256xf32>, vector<8x256xf32> -> vector<8x256xf32>
    %65 = vector.broadcast %1 : vector<1x256xf32> to vector<8x256xf32>
    %66 = arith.mulf %52, %65 : vector<8x256xf32>
    %67 = arith.addf %0, %66 : vector<8x256xf32>
    %68 = arith.addf %67, %62 : vector<8x256xf32>
    %69 = arith.addf %68, %64 : vector<8x256xf32>
    %c0_22 = arith.constant 0 : index
    %c0_23 = arith.constant 0 : index
    %70 = vector.load %arg4[%c0_22, %c0_23] : memref<8x256xf32, #tpu.memory_space<vmem>>, vector<8x256xf32>
    tpu.vector_store %arg4[%c0_22, %c0_23], %69 {strides = array<i32>} : memref<8x256xf32, #tpu.memory_space<vmem>>, vector<8x256xf32>,
    return
  }
  func.func @transform_0(%arg0: i32) -> (i32, i32) {
    %c0_i32 = arith.constant 0 : i32
    %c0_i32_0 = arith.constant 0 : i32
    return %arg0, %c0_i32 : i32, i32
  }
  func.func @transform_1(%arg0: i32) -> (i32, i32) {
    %c0_i32 = arith.constant 0 : i32
    %c0_i32_0 = arith.constant 0 : i32
    %c0_i32_1 = arith.constant 0 : i32
    return %c0_i32, %c0_i32_0 : i32, i32
  }
  func.func @transform_2(%arg0: i32) -> (i32, i32) {
    %c0_i32 = arith.constant 0 : i32
    %c0_i32_0 = arith.constant 0 : i32
    %c0_i32_1 = arith.constant 0 : i32
    return %c0_i32, %c0_i32_0 : i32, i32
  }
  func.func @transform_3(%arg0: i32) -> (i32, i32) {
    %c0_i32 = arith.constant 0 : i32
    %c0_i32_0 = arith.constant 0 : i32
    return %arg0, %c0_i32 : i32, i32
  }
}

</mosaic_0001>

<bundles_post_ra>
// kernel: tpu_custom_call.1
= control target key start
LH: loop header
LB: loop body
LE: loop exit
PB: predicated region body
PF: predicated region fallthrough
CT: control target
= control target key end

     0   :  { %8 = vsyncpa [#allocation3], 0  ;;  %s866_s0 = inlined_call_operand.hbm [shape: f32[8,256], index: 0, kind: input, shape index: {}]   ;;  %s867_s1 = inlined_call_operand.hbm [shape: f32[8,8], index: 1, kind: input, shape index: {}]   ;;  %s868_s2 = inlined_call_operand.hbm [shape: f32[2,256], index: 2, kind: input, shape index: {}]   ;;  %s869_s3 = inlined_call_operand.hbm [shape: f32[8,256], index: 3, kind: output, shape index: {}]  }
   0x1   :  { %9 = vsyncpa [#allocation6], 0  ;;  %s27_s14 = sshll.u32 %s867_s1, 4  ;;  %s28_s14 = int_to_ptr.hbm [resolvable:$true] %s27_s14 }
   0x2   :  { %10 = vsyncpa [#allocation4], 0  ;;  %s645_s15 = smov [#allocation5]   ;;  %s16_s19 = sshll.u32 %s866_s0, 4  ;;  %s17_s19 = int_to_ptr.hbm [resolvable:$true] %s16_s19 }
   0x3   :  { %s29_s16 = sshll.u32 %s645_s15, 4  ;;  %s646_s20 = smov [#allocation2]   ;;  %s30_s16 = int_to_ptr.vmem [resolvable:$true] %s29_s16 }
   0x4   :  { %32 = dma.hbm_to_vmem [thread:$0]  %s28_s14, 128, %s30_s16, [#allocation6]  }
   0x5   :  { %s18_s21 = sshll.u32 %s646_s20, 4  ;;  %s38_s24 = sshll.u32 %s868_s2, 4  ;;  %s19_s21 = int_to_ptr.vmem [resolvable:$true] %s18_s21  ;;  %s39_s24 = int_to_ptr.hbm [resolvable:$true] %s38_s24 }
   0x6   :  { %21 = dma.hbm_to_vmem [thread:$0]  %s17_s19, 256, %s19_s21, [#allocation3]  }
   0x7   :  { %s647_s1 = smov [#allocation7]  }
   0x8   :  { %s40_s25 = sshll.u32 %s647_s1, 4  ;;  %s41_s25 = int_to_ptr.vmem [resolvable:$true] %s40_s25 }
   0x9   :  { %43 = dma.hbm_to_vmem [thread:$0]  %s39_s24, 64, %s41_s25, [#allocation6]  }
   0xa   :  { %639 = dma.done.wait [#allocation3], 256  }
   0xb   :  { %640 = vsyncadd [#allocation3], 4294967040 }
   0xc   :  { %641 = dma.done.wait [#allocation6], 192  }
   0xd   :  { %642 = vsyncadd [#allocation6], 4294967104  ;;  %v60_v0 = vld [vmem:[#allocation7 + $0x1] ss:$2 sm:$0x3]  ;;  %v683_v1 = vld [vmem:[#allocation2] sm:$0xff]  ;;  %v70_v24 = vlaneseq }
   0xe   :  { %v685_v2 = vperm.slane %v60_v0, 0  ;;  %s648_s0 = smov 1   ;;  %s649_s2 = smov 127   ;;  %v690_v3 = vperm.slane %v60_v0, 1  ;;  %v692_v4 = vld [vmem:[#allocation2 + $0x8] sm:$0xff]  ;;  %v204_v5 = vld [vmem:[#allocation5] sm:$0xff] }
   0xf   :  { %112 = vrot.lane.b32.xlu2 %v683_v1, %s648_s0  ;;  %s650_s26 = smov 16   ;;  %s651_s27 = smov 112   ;;  %vm205_vm0 = vcmask 64512   ;;  %v224_v8 = vand.u32 4294901760, %v683_v1  ;;  %v370_v14 = vand.u32 4294901760, %v692_v4  ;;  %v711_v26 = vand.u32 127, %v70_v24 }
  0x10   :  { %75 = vrot.lane.b32.xlu1 %v685_v2, %s649_s2  ;;  %66 = vrot.lane.b32.xlu0 %v685_v2, %s648_s0  ;;  %v207_v6 = vsel %vm205_vm0, %v204_v5, 0  ;;  %v652_v34 = vmov 0   ;;  %s653_s28 = smov [#allocation8]   ;;  %s523_s5 = sshll.u32 %s869_s3, 4  ;;  %s524_s5 = int_to_ptr.hbm [resolvable:$true] %s523_s5 }
  0x11   :  { %v226_v7 = vand.u32 4294901760, %v207_v6  ;;  %v251_v10 = vsub.f32 %v683_v1, %v224_v8  ;;  %225 = vmatpush.msra.mxu0 %v224_v8  ;;  %301 = vmatpush.msra.mxu3 %v224_v8  ;;  %v397_v18 = vsub.f32 %v692_v4, %v370_v14  ;;  %vm79_vm1 = vcmp.lt.s32.totalorder %v711_v26, 127  ;;  %s521_s29 = sshll.u32 %s653_s28, 4  ;;  %s522_s29 = int_to_ptr.vmem [resolvable:$true] %s521_s29 }
  0x12   :  { %vm72_vm2 = vcmp.lt.s32.totalorder %v711_v26, 1  ;;  %vm86_vm11 = vcmp.lt.s32.totalorder %v711_v26, 16  ;;  %vm93_vm12 = vcmp.lt.s32.totalorder %v711_v26, 112 }
  0x13   :  { %v227_v9 = vsub.f32 %v207_v6, %v226_v7  ;;  %278 = vmatpush.msra.mxu2 %v251_v10  ;;  %v252_v12 = vand.u32 4294901760, %v251_v10  ;;  %v398_v19 = vand.u32 4294901760, %v397_v18 }
  0x15   :  { %v228_v11 = vand.u32 4294901760, %v227_v9  ;;  %281 = vmatmul.f32.vlgmr.msra.gmra.mxu2 %v227_v9  ;;  %v253_v15 = vsub.f32 %v251_v10, %v252_v12  ;;  %327 = vmatpush.msrb.mxu0 %v252_v12  ;;  %v399_v20 = vsub.f32 %v397_v18, %v398_v19 }
  0x16   :  { %371 = vmatpush.msrb.mxu2 %v370_v14 }
  0x17   :  { %114 = vrot.lane.b32.xlu2 %v692_v4, %s648_s0  ;;  %v229_v13 = vsub.f32 %v227_v9, %v228_v11  ;;  %305 = vmatmul.f32.vlgmr.msra.gmra.mxu3 %v228_v11  ;;  %v254_v17 = vand.u32 4294901760, %v253_v15  ;;  %v400_v21 = vand.u32 4294901760, %v399_v20 }
  0x18   :  { %77 = vrot.lane.b32.xlu1 %v690_v3, %s649_s2  ;;  %68 = vrot.lane.b32.xlu0 %v690_v3, %s648_s0 }
  0x19   :  { %v230_v16 = vand.u32 4294901760, %v229_v13  ;;  %255 = vmatpush.msra.mxu1 %v254_v17  ;;  %473 = vmatpush.msra.mxu2 %v398_v19 }
  0x1a   :  { %257 = vmatmul.f32.vlgmr.msra.gmra.mxu1 %v226_v7  ;;  %401 = vmatpush.msrb.mxu3 %v400_v21 }
  0x1b   :  { %231 = vmatmul.f32.vlgmr.msra.gmra.mxu0 %v230_v16  ;;  %349 = vmatpush.msrb.mxu1 %v224_v8 }
  0x1c   :  { %424 = vmatpush.msra.mxu0 %v397_v18  ;;  %495 = vmatpush.msra.mxu3 %v370_v14 }
  0x1d   :  { %377 = vmatmul.f32.vlgmr.msrb.gmra.mxu2 %v230_v16  ;;  %447 = vmatpush.msra.mxu1 %v370_v14 }
  0x1f   :  { %82 = vrot.lane.b32.xlu2 %v685_v2, %s650_s26  ;;  %403 = vmatmul.f32.vlgmr.msrb.gmra.mxu3 %v226_v7 }
  0x20   :  { %120 = vrot.lane.b32.xlu1 %v692_v4, %s649_s2  ;;  %118 = vrot.lane.b32.xlu0 %v683_v1, %s649_s2 }
  0x22   :  { %351 = vmatmul.f32.vlgmr.msrb.gmra.mxu1 %v226_v7 }
  0x23   :  { %329 = vmatmul.f32.vlgmr.msrb.gmra.mxu0 %v226_v7 }
  0x25   :  { %475 = vmatmul.f32.vlgmr.msra.gmra.mxu2 %v226_v7 }
  0x27   :  { %91 = vrot.lane.b32.xlu2 %v690_v3, %s651_s27  ;;  %497 = vmatmul.f32.vlgmr.msra.gmra.mxu3 %v226_v7 }
  0x28   :  { %84 = vrot.lane.b32.xlu0 %v690_v3, %s650_s26  ;;  %89 = vrot.lane.b32.xlu1 %v685_v2, %s651_s27 }
  0x2a   :  { %451 = vmatmul.f32.vlgmr.msra.gmra.mxu1 %v228_v11 }
  0x2b   :  { %427 = vmatmul.f32.vlgmr.msra.gmra.mxu0 %v227_v9 }
  0x69   :  { %v113_v25 = vpop.permute.xlu2 %112 }
  0x71   :  { %v115_v33 = vpop.permute.xlu2 %114 }
  0x72   :  { %v116_v43 = vsel %vm72_vm2, %v113_v25, %v115_v33  ;;  %v117_v44 = vsel %vm72_vm2, %v115_v33, %v113_v25 }
  0x79   :  { %v83_v8 = vpop.permute.xlu2 %82 }
  0x81   :  { %v92_v13 = vpop.permute.xlu2 %91 }
  0x82   :  { %v76_v22 = vpop.permute.xlu1 %75  ;;  %v67_v23 = vpop.permute.xlu0 %66 }
  0x8a   :  { %v78_v27 = vpop.permute.xlu1 %77  ;;  %v69_v28 = vpop.permute.xlu0 %68 }
  0x8b   :  { %v80_v29 = vsel %vm79_vm1, %v76_v22, %v78_v27  ;;  %v81_v30 = vsel %vm79_vm1, %v78_v27, %v76_v22  ;;  %v73_v31 = vsel %vm72_vm2, %v67_v23, %v69_v28  ;;  %v74_v32 = vsel %vm72_vm2, %v69_v28, %v67_v23 }
  0x8c   :  { %vm98_vm3 = vcmp.eq.f32.partialorder %v80_v29, %v685_v2  ;;  %vm99_vm4 = vcmp.eq.f32.partialorder %v81_v30, %v690_v3  ;;  %vm96_vm5 = vcmp.eq.f32.partialorder %v74_v32, %v685_v2  ;;  %vm97_vm6 = vcmp.eq.f32.partialorder %v73_v31, %v690_v3 }
  0x8d   :  { %v134_v35 = vsel %vm98_vm3, 1, %v652_v34  ;;  %v135_v36 = vsel %vm99_vm4, 1, %v652_v34  ;;  %v124_v37 = vsel %vm96_vm5, 1, %v652_v34  ;;  %v125_v38 = vsel %vm97_vm6, 1, %v652_v34 }
  0x8e   :  { %v126_v39 = vperm.slane %v124_v37, 0  ;;  %v127_v40 = vperm.slane %v125_v38, 0  ;;  %v136_v41 = vperm.slane %v134_v35, 0  ;;  %v137_v42 = vperm.slane %v135_v36, 0 }
  0x90   :  { %vm735_vm7 = vcmp.eq.s32.totalorder %v126_v39, 1  ;;  %vm739_vm8 = vcmp.eq.s32.totalorder %v127_v40, 1  ;;  %vm749_vm9 = vcmp.eq.s32.totalorder %v136_v41, 1  ;;  %vm139_vm10 = vcmp.eq.s32.totalorder %v137_v42, 1 }
  0x91   :  { %v130_v47 = vsel %vm735_vm7, %v117_v44, 0.0  ;;  %v131_v48 = vsel %vm739_vm8, %v116_v43, 0.0  ;;  %v145_v62 = vsel %vm739_vm8, %v116_v43, -inf  ;;  %v144_v63 = vsel %vm735_vm7, %v117_v44, -inf }
  0x92   :  { %v121_v49 = vpop.permute.xlu1 %120  ;;  %v119_v50 = vpop.permute.xlu0 %118  ;;  %v132_v51 = vadd.f32 %v130_v47, %v683_v1  ;;  %v133_v52 = vadd.f32 %v131_v48, %v692_v4 }
  0x93   :  { %v122_v54 = vsel %vm79_vm1, %v119_v50, %v121_v49  ;;  %v123_v55 = vsel %vm79_vm1, %v121_v49, %v119_v50 }
  0x94   :  { %v140_v56 = vsel %vm749_vm9, %v122_v54, 0.0  ;;  %v141_v57 = vsel %vm139_vm10, %v123_v55, 0.0  ;;  %v147_v60 = vsel %vm139_vm10, %v123_v55, -inf  ;;  %v146_v61 = vsel %vm749_vm9, %v122_v54, -inf }
  0x95   :  { %v759_v58 = vadd.f32 %v140_v56, %v132_v51  ;;  %v761_v59 = vadd.f32 %v141_v57, %v133_v52  ;;  %v149_v0 = vmax.f32 %v145_v62, %v147_v60  ;;  %v148_v5 = vmax.f32 %v144_v63, %v146_v61  ;;  %v58_v57 = vld [vmem:[#allocation7] ss:$2 sm:$0x3] }
  0x97   :  { %158 = vrot.lane.b32.xlu2 %v759_v58, %s651_s27  ;;  %152 = vrot.lane.b32.xlu0 %v759_v58, %s650_s26  ;;  %v776_v6 = vmax.f32 %v692_v4, %v149_v0  ;;  %v779_v7 = vmax.f32 %v683_v1, %v148_v5  ;;  %v258_v23 = vpop.f32.mrf.mxu1 }
  0x98   :  { %154 = vrot.lane.b32.xlu1 %v761_v59, %s650_s26  ;;  %v232_v18 = vpop.f32.mrf.mxu0  ;;  %v282_v28 = vpop.f32.mrf.mxu2 }
  0x99   :  { %v259_v46 = vadd.f32 %v258_v23, %v232_v18 }
  0x9a   :  { %v85_v9 = vpop.permute.xlu0 %84  ;;  %v90_v12 = vpop.permute.xlu1 %89 }
  0x9b   :  { %v87_v10 = vsel %vm86_vm11, %v83_v8, %v85_v9  ;;  %v88_v11 = vsel %vm86_vm11, %v85_v9, %v83_v8  ;;  %v94_v16 = vsel %vm93_vm12, %v90_v12, %v92_v13  ;;  %v95_v17 = vsel %vm93_vm12, %v92_v13, %v90_v12  ;;  %v306_v27 = vpop.f32.mrf.mxu3 }
  0x9c   :  { %v100_v14 = vsub.f32 %v88_v11, %v685_v2  ;;  %v101_v15 = vsub.f32 %v87_v10, %v690_v3  ;;  %v106_v19 = vsub.f32 %v94_v16, %v685_v2  ;;  %v107_v20 = vsub.f32 %v95_v17, %v690_v3 }
  0x9d   :  { %v283_v0 = vadd.f32 %v282_v28, %v259_v46  ;;  %v502_v9 = vperm.slane %v58_v57, 0  ;;  %v503_v10 = vperm.slane %v58_v57, 1 }
  0x9e   :  { %v102_v21 = vand.u32 2147483647, %v100_v14  ;;  %v103_v22 = vand.u32 2147483647, %v101_v15  ;;  %v108_v24 = vand.u32 2147483647, %v106_v19 }
  0x9f   :  { %166 = vrot.lane.b32.xlu2 %v776_v6, %s650_s26  ;;  %160 = vrot.lane.b32.xlu0 %v761_v59, %s651_s27  ;;  %v109_v25 = vand.u32 2147483647, %v107_v20  ;;  %v352_v37 = vpop.f32.mrf.mxu1  ;;  %v307_v14 = vadd.f32 %v306_v27, %v283_v0 }
  0xa0   :  { %164 = vrot.lane.b32.xlu1 %v779_v7, %s650_s26  ;;  %vm104_vm13 = vcmp.eq.f32.partialorder %v102_v21, 1.0  ;;  %vm105_vm14 = vcmp.eq.f32.partialorder %v103_v22, 1.0  ;;  %vm110_vm15 = vcmp.eq.f32.partialorder %v108_v24, 1.0  ;;  %v330_v31 = vpop.f32.mrf.mxu0 }
  0xa1   :  { %vm111_vm0 = vcmp.eq.f32.partialorder %v109_v25, 1.0  ;;  %v176_v29 = vsel %vm104_vm13, 1, %v652_v34  ;;  %v177_v30 = vsel %vm105_vm14, 1, %v652_v34  ;;  %v186_v35 = vsel %vm110_vm15, 1, %v652_v34 }
  0xa2   :  { %v178_v33 = vperm.slane %v176_v29, 0  ;;  %v179_v3 = vperm.slane %v177_v30, 0  ;;  %v187_v36 = vsel %vm111_vm0, 1, %v652_v34  ;;  %v188_v39 = vperm.slane %v186_v35, 0  ;;  %v378_v34 = vpop.f32.mrf.mxu2 }
  0xa3   :  { %v189_v40 = vperm.slane %v187_v36, 0  ;;  %v404_v41 = vpop.f32.mrf.mxu3  ;;  %v331_v28 = vadd.f32 %v330_v31, %v307_v14 }
  0xa4   :  { %vm813_vm1 = vcmp.eq.s32.totalorder %v178_v33, 1  ;;  %vm817_vm2 = vcmp.eq.s32.totalorder %v179_v3, 1  ;;  %v405_v48 = vadd.f32 %v404_v41, %v378_v34  ;;  %vm829_vm3 = vcmp.eq.s32.totalorder %v188_v39, 1 }
  0xa5   :  { %vm833_vm4 = vcmp.eq.s32.totalorder %v189_v40, 1  ;;  %v353_v36 = vadd.f32 %v352_v37, %v331_v28 }
  0xa7   :  { %170 = vrot.lane.b32.xlu0 %v779_v7, %s651_s27  ;;  %v452_v8 = vpop.f32.mrf.mxu1 }
  0xa8   :  { %172 = vrot.lane.b32.xlu1 %v776_v6, %s651_s27  ;;  %v428_v54 = vpop.f32.mrf.mxu0 }
  0xa9   :  { %v429_v5 = vadd.f32 %v428_v54, %v405_v48 }
  0xaa   :  { %v476_v19 = vpop.f32.mrf.mxu2 }
  0xab   :  { %v453_v18 = vadd.f32 %v452_v8, %v429_v5 }
  0xf1   :  { %v159_v38 = vpop.permute.xlu2 %158 }
  0xf9   :  { %v167_v13 = vpop.permute.xlu2 %166 }
 0x109   :  { %v153_v32 = vpop.permute.xlu0 %152 }
 0x10a   :  { %v155_v2 = vpop.permute.xlu1 %154 }
 0x10b   :  { %v156_v42 = vsel %vm86_vm11, %v153_v32, %v155_v2  ;;  %v157_v43 = vsel %vm86_vm11, %v155_v2, %v153_v32  ;;  %v477_v32 = vadd.f32 %v476_v19, %v453_v18  ;;  %v498_v2 = vpop.f32.mrf.mxu3 }
 0x10c   :  { %v182_v49 = vsel %vm813_vm1, %v157_v43, 0.0  ;;  %v183_v50 = vsel %vm817_vm2, %v156_v42, 0.0 }
 0x10d   :  { %v184_v62 = vadd.f32 %v182_v49, %v759_v58  ;;  %v185_v63 = vadd.f32 %v183_v50, %v761_v59  ;;  %v499_v39 = vadd.f32 %v498_v2, %v477_v32 }
 0x111   :  { %v161_v47 = vpop.permute.xlu0 %160 }
 0x112   :  { %v162_v51 = vsel %vm93_vm12, %v159_v38, %v161_v47  ;;  %v163_v52 = vsel %vm93_vm12, %v161_v47, %v159_v38  ;;  %v165_v53 = vpop.permute.xlu1 %164 }
 0x113   :  { %v192_v60 = vsel %vm829_vm3, %v162_v51, 0.0  ;;  %v193_v61 = vsel %vm833_vm4, %v163_v52, 0.0  ;;  %v168_v15 = vsel %vm86_vm11, %v165_v53, %v167_v13  ;;  %v169_v16 = vsel %vm86_vm11, %v167_v13, %v165_v53 }
 0x114   :  { %v194_v11 = vadd.f32 %v192_v60, %v184_v62  ;;  %v195_v12 = vadd.f32 %v193_v61, %v185_v63  ;;  %v196_v23 = vsel %vm813_vm1, %v169_v16, -inf  ;;  %v197_v24 = vsel %vm817_vm2, %v168_v15, -inf }
 0x116   :  { %v506_v59 = vmul.f32 %v502_v9, %v194_v11  ;;  %v507_v20 = vmul.f32 %v503_v10, %v195_v12 }
 0x118   :  { %v508_v26 = vadd.f32 %v506_v59, %v683_v1  ;;  %v509_v35 = vadd.f32 %v507_v20, %v692_v4 }
 0x119   :  { %v171_v17 = vpop.permute.xlu0 %170 }
 0x11a   :  { %v173_v58 = vpop.permute.xlu1 %172 }
 0x11b   :  { %v174_v21 = vsel %vm93_vm12, %v171_v17, %v173_v58  ;;  %v175_v22 = vsel %vm93_vm12, %v173_v58, %v171_v17 }
 0x11c   :  { %v198_v25 = vsel %vm829_vm3, %v174_v21, -inf  ;;  %v199_v27 = vsel %vm833_vm4, %v175_v22, -inf }
 0x11d   :  { %v200_v29 = vmax.f32 %v196_v23, %v198_v25  ;;  %v201_v30 = vmax.f32 %v197_v24, %v199_v27 }
 0x11f   :  { %v202_v33 = vmax.f32 %v779_v7, %v200_v29  ;;  %v203_v3 = vmax.f32 %v776_v6, %v201_v30 }
 0x121   :  { %v510_v38 = vadd.f32 %v508_v26, %v202_v33  ;;  %v511_v40 = vadd.f32 %v509_v35, %v203_v3 }
 0x123   :  { %v513_v31 = vadd.f32 %v511_v40, %v499_v39  ;;  %v512_v41 = vadd.f32 %v510_v38, %v353_v36 }
 0x125   :  { %515 = vst [vmem:[#allocation8 + $0x8] sm:$0xff] %v513_v31 }
 0x126   :  { %514 = vst [vmem:[#allocation8] sm:$0xff] %v512_v41 }
 0x127   :  { %526 = dma.vmem_to_hbm [thread:$0]  %s522_s29, 256, %s524_s5, [#allocation4]  }
 0x128   :  { %643 = dma.done.wait [#allocation4], 256  }
 0x129   :  { %644 = vsyncadd [#allocation4], 4294967040 }
 0x12a   :  { %531 = vsyncpa [#allocation3], 1 }
 0x12b   :  { %532 = vsyncpa [#allocation6], 1 }
 0x12c   :  { %533 = vsyncpa [#allocation4], 1 }

</bundles_post_ra>
